<compile_context>
chip_gen: v5e
topology: v5e:2x2
jax: 0.10.0
libtpu: 0.0.40
codegen_flags: <defaults>
</compile_context>

<pallas_src>
import jax
import jax.numpy as jnp
from jax.experimental import pallas as pl
from jax.experimental.pallas import tpu as pltpu

LANE = 128  # TPU lane width


def _round_up(n, m):
    return ((n + m - 1) // m) * m


def _mlp_kernel(x_ref, w1_ref, b1_ref, w2_ref, b2_ref, w3_ref, b3_ref, o_ref):
    # x_ref: (TM, in_size) bf16; w*: bf16; b*: (1, N) f32; o_ref: (TM, OUT_P) bf16.
    x = x_ref[...]  # already bf16, no cast needed

    # linear1 -> dropout(p=0, identity) -> relu   (K=4 dot, accumulate in f32 on the MXU)
    h1 = jnp.dot(x, w1_ref[...], preferred_element_type=jnp.float32) + b1_ref[...]
    h1 = jnp.maximum(h1, 0.0).astype(jnp.bfloat16)
    # TODO(synk): for p>0 training-mode dropout, seed once with pltpu.prng_seed, draw
    # pltpu.prng_random_bits per activation tile, fuse the mask via compare+select and
    # scale by pl.reciprocal(1-p, approx=True).

    # linear2 -> dropout(p=0, identity) -> relu
    h2 = jnp.dot(h1, w2_ref[...], preferred_element_type=jnp.float32) + b2_ref[...]
    h2 = jnp.maximum(h2, 0.0).astype(jnp.bfloat16)

    # linear3 (no activation)
    y = jnp.dot(h2, w3_ref[...], preferred_element_type=jnp.float32) + b3_ref[...]
    o_ref[...] = y.astype(o_ref.dtype)  # bf16 writeback (lane-dense 128-wide block)


def net_forward(x, padded_params, out_size, tm=2048, p=0.0, training=False):
    """x: (B, in_size) float32. padded_params: dict of lane-padded w1,b1,w2,b2,w3,b3
    (weights bf16, biases f32). Returns (B, out_size) float32."""
    # The fused kernel implements the p=0 / eval-mode forward (dropout == identity).
    assert p == 0.0 or not training, "training-mode dropout (p>0) not implemented in kernel"

    w1, b1 = padded_params["w1"], padded_params["b1"]
    w2, b2 = padded_params["w2"], padded_params["b2"]
    w3, b3 = padded_params["w3"], padded_params["b3"]

    B, in_size = x.shape
    assert w1.shape[0] == in_size, "w1 must be stored (in_size, hidden_padded)"
    H_P = w1.shape[1]
    OUT_P = w3.shape[1]

    # Batch tile: biggest of (tm, batch rounded to sublane multiple).
    TM = min(tm, _round_up(B, 8))
    n_blocks = pl.cdiv(B, TM)
    B_pad = n_blocks * TM

    # Only the batch dim is padded (zeros); features stay at the true in_size so the
    # input HBM stream carries no padding bytes.  Pre-cast to bf16 halves input DMA.
    x_bf = x.astype(jnp.bfloat16)
    if B_pad == B:
        x_p = x_bf
    else:
        x_p = jnp.zeros((B_pad, in_size), jnp.bfloat16).at[:B, :].set(x_bf)

    out = pl.pallas_call(
        _mlp_kernel,
        out_shape=jax.ShapeDtypeStruct((B_pad, OUT_P), jnp.bfloat16),
        grid=(n_blocks,),
        in_specs=[
            pl.BlockSpec((TM, in_size), lambda i: (i, 0)),   # x: tiled over batch, no lane pad
            pl.BlockSpec((in_size, H_P), lambda i: (0, 0)),  # w1: resident
            pl.BlockSpec((1, H_P), lambda i: (0, 0)),        # b1: resident
            pl.BlockSpec((H_P, H_P), lambda i: (0, 0)),      # w2: resident
            pl.BlockSpec((1, H_P), lambda i: (0, 0)),        # b2: resident
            pl.BlockSpec((H_P, OUT_P), lambda i: (0, 0)),    # w3: resident
            pl.BlockSpec((1, OUT_P), lambda i: (0, 0)),      # b3: resident
        ],
        out_specs=pl.BlockSpec((TM, OUT_P), lambda i: (i, 0)),  # lane-dense bf16 output
        compiler_params=pltpu.CompilerParams(
            dimension_semantics=("parallel",),  # megacore / 2-TC sharding when n_blocks >= 2
        ),
    )(x_p, w1, b1, w2, b2, w3, b3)

    # Slice away padded batch rows (their garbage values never leave the wrapper) and the
    # padded feature lanes; cast logits back to f32 for the caller.
    return out[:B, :out_size].astype(jnp.float32)


def init_params(key, in_size, n_hidden, out_size):
    """Deterministic init mirroring PyTorch nn.Linear default (U(-1/sqrt(fan_in), +))."""
    ks = jax.random.split(key, 6)

    def linear(kw, kb, fan_in, fan_out):
        bound = 1.0 / jnp.sqrt(fan_in)
        # stored as (in, out) so kernel computes x @ W
        w = jax.random.uniform(kw, (fan_in, fan_out), jnp.float32, -bound, bound)
        b = jax.random.uniform(kb, (1, fan_out), jnp.float32, -bound, bound)
        return w, b

    w1, b1 = linear(ks[0], ks[1], in_size, n_hidden)
    w2, b2 = linear(ks[2], ks[3], n_hidden, n_hidden)
    w3, b3 = linear(ks[4], ks[5], n_hidden, out_size)
    return {"w1": w1, "b1": b1, "w2": w2, "b2": b2, "w3": w3, "b3": b3}


def pad_params(params, in_size, n_hidden, out_size, lane=LANE):
    """Zero-pad the hidden/out feature dims up to the lane width; weights in bf16, biases
    in f32.  The INPUT feature dim of w1 is left at the true in_size (x is not lane-padded).
    Padded columns/rows are exactly zero so the sliced output is unchanged."""
    H_P = _round_up(n_hidden, lane)
    OUT_P = _round_up(out_size, lane)

    def pad2(a, rows, cols, dtype):
        buf = jnp.zeros((rows, cols), dtype)
        return buf.at[: a.shape[0], : a.shape[1]].set(a.astype(dtype))

    return {
        "w1": pad2(params["w1"], in_size, H_P, jnp.bfloat16),
        "b1": pad2(params["b1"], 1, H_P, jnp.float32),
        "w2": pad2(params["w2"], H_P, H_P, jnp.bfloat16),
        "b2": pad2(params["b2"], 1, H_P, jnp.float32),
        "w3": pad2(params["w3"], H_P, OUT_P, jnp.bfloat16),
        "b3": pad2(params["b3"], 1, OUT_P, jnp.float32),
    }


def net_reference(x, p):
    """Pure-JAX f32 reference of the same forward pass (p=0 dropout => identity)."""
    h1 = jnp.maximum(x @ p["w1"] + p["b1"], 0.0)
    h2 = jnp.maximum(h1 @ p["w2"] + p["b2"], 0.0)
    return h2 @ p["w3"] + p["b3"]


if __name__ == "__main__":
    # Lab 11 is a small point-classifier style net: in_size=4, hidden=32, out=3
    in_size, n_hidden, out_size = 4, 32, 3
    batch = 8

    key = jax.random.PRNGKey(0)
    kx, kp = jax.random.split(key)
    x = jax.random.normal(kx, (batch, in_size), dtype=jnp.float32)
    params = init_params(kp, in_size, n_hidden, out_size)
    padded = pad_params(params, in_size, n_hidden, out_size)

    out = net_forward(x, padded, out_size)
    out = jax.block_until_ready(out)

    ref = net_reference(x, params)
    assert out.shape == (batch, out_size)
    # bf16 matmul operands + bf16 output with f32 accumulation => small rounding vs. the
    # f32 reference.  Logits here are O(1), so 3e-2 abs/rel absorbs bf16 quantization.
    assert jnp.allclose(out, ref, atol=3e-2, rtol=3e-2), (
        f"max abs err {float(jnp.max(jnp.abs(out - ref)))}")

    print("KERNEL_OK")
</pallas_src>

<mosaic_0001>
module attributes {stable_mosaic.version = 11 : i64} {
  func.func @_mlp_kernel(%arg0: i32, %arg1: memref<8x4xbf16, #tpu.memory_space<vmem>>, %arg2: memref<4x128xbf16, #tpu.memory_space<vmem>>, %arg3: memref<1x128xf32, #tpu.memory_space<vmem>>, %arg4: memref<128x128xbf16, #tpu.memory_space<vmem>>, %arg5: memref<1x128xf32, #tpu.memory_space<vmem>>, %arg6: memref<128x128xbf16, #tpu.memory_space<vmem>>, %arg7: memref<1x128xf32, #tpu.memory_space<vmem>>, %arg8: memref<8x128xbf16, #tpu.memory_space<vmem>>) attributes {dimension_semantics = [#tpu.dimension_semantics<parallel>], iteration_bounds = array<i64: 1>, scalar_prefetch = 0 : i64, scratch_operands = 0 : i64, tpu.core_type = #tpu.core_type<tc>, window_params = [{transform_indices = @transform_0, window_bounds = array<i64: 8, 4>}, {pipeline_mode = #tpu.pipeline_mode<synchronous>, transform_indices = @transform_1, window_bounds = array<i64: 4, 128>}, {pipeline_mode = #tpu.pipeline_mode<synchronous>, transform_indices = @transform_2, window_bounds = array<i64: 1, 128>}, {pipeline_mode = #tpu.pipeline_mode<synchronous>, transform_indices = @transform_3, window_bounds = array<i64: 128, 128>}, {pipeline_mode = #tpu.pipeline_mode<synchronous>, transform_indices = @transform_4, window_bounds = array<i64: 1, 128>}, {pipeline_mode = #tpu.pipeline_mode<synchronous>, transform_indices = @transform_5, window_bounds = array<i64: 128, 128>}, {pipeline_mode = #tpu.pipeline_mode<synchronous>, transform_indices = @transform_6, window_bounds = array<i64: 1, 128>}, {transform_indices = @transform_7, window_bounds = array<i64: 8, 128>}]} {
    %c0 = arith.constant 0 : index
    %c0_0 = arith.constant 0 : index
    %0 = vector.load %arg1[%c0, %c0_0] : memref<8x4xbf16, #tpu.memory_space<vmem>>, vector<8x4xbf16>
    %c0_1 = arith.constant 0 : index
    %c0_2 = arith.constant 0 : index
    %1 = vector.load %arg2[%c0_1, %c0_2] : memref<4x128xbf16, #tpu.memory_space<vmem>>, vector<4x128xbf16>
    %cst = arith.constant dense<0.000000e+00> : vector<8x128xf32>
    %2 = tpu.matmul %0, %1, %cst {dimension_numbers = #tpu.dot_dimension_numbers<[1], [0], [0], [1], [0, 0, 1, 1], [], []>} : vector<8x4xbf16>, vector<4x128xbf16>, vector<8x128xf32> -> vector<8x128xf32>
    %c0_3 = arith.constant 0 : index
    %c0_4 = arith.constant 0 : index
    %3 = vector.load %arg3[%c0_3, %c0_4] : memref<1x128xf32, #tpu.memory_space<vmem>>, vector<1x128xf32>
    %4 = vector.broadcast %3 : vector<1x128xf32> to vector<8x128xf32>
    %5 = arith.addf %2, %4 : vector<8x128xf32>
    %cst_5 = arith.constant 0.000000e+00 : f32
    %6 = vector.broadcast %cst_5 : f32 to vector<8x128xf32>
    %7 = arith.maximumf %5, %6 : vector<8x128xf32>
    %8 = arith.truncf %7 : vector<8x128xf32> to vector<8x128xbf16>
    %c0_6 = arith.constant 0 : index
    %c0_7 = arith.constant 0 : index
    %9 = vector.load %arg4[%c0_6, %c0_7] : memref<128x128xbf16, #tpu.memory_space<vmem>>, vector<128x128xbf16>
    %cst_8 = arith.constant dense<0.000000e+00> : vector<8x128xf32>
    %10 = tpu.matmul %8, %9, %cst_8 {dimension_numbers = #tpu.dot_dimension_numbers<[1], [0], [0], [1], [0, 0, 1, 1], [], []>} : vector<8x128xbf16>, vector<128x128xbf16>, vector<8x128xf32> -> vector<8x128xf32>
    %c0_9 = arith.constant 0 : index
    %c0_10 = arith.constant 0 : index
    %11 = vector.load %arg5[%c0_9, %c0_10] : memref<1x128xf32, #tpu.memory_space<vmem>>, vector<1x128xf32>
    %12 = vector.broadcast %11 : vector<1x128xf32> to vector<8x128xf32>
    %13 = arith.addf %10, %12 : vector<8x128xf32>
    %cst_11 = arith.constant 0.000000e+00 : f32
    %14 = vector.broadcast %cst_11 : f32 to vector<8x128xf32>
    %15 = arith.maximumf %13, %14 : vector<8x128xf32>
    %16 = arith.truncf %15 : vector<8x128xf32> to vector<8x128xbf16>
    %c0_12 = arith.constant 0 : index
    %c0_13 = arith.constant 0 : index
    %17 = vector.load %arg6[%c0_12, %c0_13] : memref<128x128xbf16, #tpu.memory_space<vmem>>, vector<128x128xbf16>
    %cst_14 = arith.constant dense<0.000000e+00> : vector<8x128xf32>
    %18 = tpu.matmul %16, %17, %cst_14 {dimension_numbers = #tpu.dot_dimension_numbers<[1], [0], [0], [1], [0, 0, 1, 1], [], []>} : vector<8x128xbf16>, vector<128x128xbf16>, vector<8x128xf32> -> vector<8x128xf32>
    %c0_15 = arith.constant 0 : index
    %c0_16 = arith.constant 0 : index
    %19 = vector.load %arg7[%c0_15, %c0_16] : memref<1x128xf32, #tpu.memory_space<vmem>>, vector<1x128xf32>
    %20 = vector.broadcast %19 : vector<1x128xf32> to vector<8x128xf32>
    %21 = arith.addf %18, %20 : vector<8x128xf32>
    %22 = arith.truncf %21 : vector<8x128xf32> to vector<8x128xbf16>
    %c0_17 = arith.constant 0 : index
    %c0_18 = arith.constant 0 : index
    %23 = vector.load %arg8[%c0_17, %c0_18] : memref<8x128xbf16, #tpu.memory_space<vmem>>, vector<8x128xbf16>
    tpu.vector_store %arg8[%c0_17, %c0_18], %22 {strides = array<i32>} : memref<8x128xbf16, #tpu.memory_space<vmem>>, vector<8x128xbf16>,
    return
  }
  func.func @transform_0(%arg0: i32) -> (i32, i32) {
    %c0_i32 = arith.constant 0 : i32
    %c0_i32_0 = arith.constant 0 : i32
    return %arg0, %c0_i32 : i32, i32
  }
  func.func @transform_1(%arg0: i32) -> (i32, i32) {
    %c0_i32 = arith.constant 0 : i32
    %c0_i32_0 = arith.constant 0 : i32
    %c0_i32_1 = arith.constant 0 : i32
    return %c0_i32, %c0_i32_0 : i32, i32
  }
  func.func @transform_2(%arg0: i32) -> (i32, i32) {
    %c0_i32 = arith.constant 0 : i32
    %c0_i32_0 = arith.constant 0 : i32
    %c0_i32_1 = arith.constant 0 : i32
    return %c0_i32, %c0_i32_0 : i32, i32
  }
  func.func @transform_3(%arg0: i32) -> (i32, i32) {
    %c0_i32 = arith.constant 0 : i32
    %c0_i32_0 = arith.constant 0 : i32
    %c0_i32_1 = arith.constant 0 : i32
    return %c0_i32, %c0_i32_0 : i32, i32
  }
  func.func @transform_4(%arg0: i32) -> (i32, i32) {
    %c0_i32 = arith.constant 0 : i32
    %c0_i32_0 = arith.constant 0 : i32
    %c0_i32_1 = arith.constant 0 : i32
    return %c0_i32, %c0_i32_0 : i32, i32
  }
  func.func @transform_5(%arg0: i32) -> (i32, i32) {
    %c0_i32 = arith.constant 0 : i32
    %c0_i32_0 = arith.constant 0 : i32
    %c0_i32_1 = arith.constant 0 : i32
    return %c0_i32, %c0_i32_0 : i32, i32
  }
  func.func @transform_6(%arg0: i32) -> (i32, i32) {
    %c0_i32 = arith.constant 0 : i32
    %c0_i32_0 = arith.constant 0 : i32
    %c0_i32_1 = arith.constant 0 : i32
    return %c0_i32, %c0_i32_0 : i32, i32
  }
  func.func @transform_7(%arg0: i32) -> (i32, i32) {
    %c0_i32 = arith.constant 0 : i32
    %c0_i32_0 = arith.constant 0 : i32
    return %arg0, %c0_i32 : i32, i32
  }
}

</mosaic_0001>

<bundles_post_ra>
// kernel: tpu_custom_call.1
= control target key start
LH: loop header
LB: loop body
LE: loop exit
PB: predicated region body
PF: predicated region fallthrough
CT: control target
= control target key end

     0   :  { %12 = vsyncpa [#allocation3], 0  ;;  %s509_s0 = inlined_call_operand.vmem [shape: bf16[8,4], index: 0, kind: input, shape index: {}]   ;;  %s510_s1 = inlined_call_operand.vmem [shape: bf16[4,128], index: 1, kind: input, shape index: {}]   ;;  %s511_s2 = inlined_call_operand.vmem [shape: f32[1,128], index: 2, kind: input, shape index: {}]   ;;  %s512_s3 = inlined_call_operand.hbm [shape: bf16[128,128], index: 3, kind: input, shape index: {}]   ;;  %s513_s4 = inlined_call_operand.vmem [shape: f32[1,128], index: 4, kind: input, shape index: {}]   ;;  %s514_s5 = inlined_call_operand.hbm [shape: bf16[128,128], index: 5, kind: input, shape index: {}]   ;;  %s515_s6 = inlined_call_operand.vmem [shape: f32[1,128], index: 6, kind: input, shape index: {}]   ;;  %s516_s7 = inlined_call_operand.hbm [shape: bf16[8,128], index: 7, kind: output, shape index: {}]  }
   0x1   :  { %13 = vsyncpa [#allocation6], 0 }
   0x2   :  { %14 = vsyncpa [#allocation4], 0  ;;  %s25_s26 = sshll.u32 %s512_s3, 4  ;;  %s440_s27 = smov [#allocation2]   ;;  %s26_s26 = int_to_ptr.hbm [resolvable:$true] %s25_s26 }
   0x3   :  { %s27_s28 = sshll.u32 %s440_s27, 4  ;;  %s40_s8 = sshll.u32 %s514_s5, 4  ;;  %s28_s28 = int_to_ptr.vmem [resolvable:$true] %s27_s28  ;;  %s41_s8 = int_to_ptr.hbm [resolvable:$true] %s40_s8 }
   0x4   :  { %s441_s9 = smov 64   ;;  %s442_s10 = smov 4  }
   0x5   :  { %33 = dma.hbm_to_vmem [thread:$0]  %s26_s26, 1024, %s28_s28, [#allocation3], %s441_s9, %s441_s9, %s442_s10  }
   0x6   :  { %s443_s11 = smov [#allocation5]  }
   0x7   :  { %s42_s12 = sshll.u32 %s443_s11, 4  ;;  %s43_s12 = int_to_ptr.vmem [resolvable:$true] %s42_s12 }
   0x8   :  { %48 = dma.hbm_to_vmem [thread:$0]  %s41_s8, 1024, %s43_s12, [#allocation6], %s441_s9, %s441_s9, %s442_s10  }
   0x9   :  { %434 = dma.done.wait [#allocation3], 1024  }
   0xa   :  { %435 = vsyncadd [#allocation3], 4294966272 }
   0xb   :  { %436 = dma.done.wait [#allocation6], 1024  }
   0xc   :  { %437 = vsyncadd [#allocation6], 4294966272  ;;  %vm70_vm0 = vcmask 1041408   ;;  %v61_v0 = vld [vmem:[%s510_s1] sm:$0x3]  ;;  %v345_v1 = vld [vmem:[#allocation2 + $0x38] sm:$0xff] }
   0xd   :  { %v72_v2 = vsel %vm70_vm0, %v61_v0, 0  ;;  %v60_v3 = vld [vmem:[%s509_s0] sm:$0xf]  ;;  %vm66_vm1 = vcmask 31744   ;;  %157 = vmatpush.bf16.msra.mxu1 %v345_v1  ;;  %v344_v4 = vld [vmem:[#allocation2 + $0x30] sm:$0xff]  ;;  %v343_v5 = vld [vmem:[#allocation2 + $0x28] sm:$0xff] }
   0xe   :  { %81 = vmatpush.bf16.msra.mxu0 %v72_v2  ;;  %v342_v6 = vld [vmem:[#allocation2 + $0x20] sm:$0xff]  ;;  %v341_v7 = vld [vmem:[#allocation2 + $0x18] sm:$0xff]  ;;  %v340_v8 = vld [vmem:[#allocation2 + $0x10] sm:$0xff]  ;;  %s444_s18 = smov [#allocation7]   ;;  %s262_s22 = sshll.u32 %s516_s7, 4  ;;  %s263_s22 = int_to_ptr.hbm [resolvable:$true] %s262_s22 }
   0xf   :  { %v339_v9 = vld [vmem:[#allocation2 + $0x8] sm:$0xff]  ;;  %v338_v10 = vld [vmem:[#allocation2] sm:$0xff]  ;;  %v353_v11 = vld [vmem:[#allocation5 + $0x38] sm:$0xff]  ;;  %s260_s19 = sshll.u32 %s444_s18, 4  ;;  %s261_s19 = int_to_ptr.vmem [resolvable:$true] %s260_s19 }
  0x10   :  { %240 = vmatpush.bf16.msra.mxu2 %v353_v11  ;;  %v352_v12 = vld [vmem:[#allocation5 + $0x30] sm:$0xff]  ;;  %v351_v13 = vld [vmem:[#allocation5 + $0x28] sm:$0xff]  ;;  %v350_v14 = vld [vmem:[#allocation5 + $0x20] sm:$0xff] }
  0x11   :  { %273 = vmatmul.msk.bf16.vlgmr.msra.gmra.mxu0 %vm66_vm1, %v60_v3  ;;  %158 = vmatpush.bf16.msra.mxu1 %v344_v4  ;;  %v349_v15 = vld [vmem:[#allocation5 + $0x18] sm:$0xff]  ;;  %v348_v16 = vld [vmem:[#allocation5 + $0x10] sm:$0xff]  ;;  %v359_v17 = vld [vmem:[%s511_s2] ss:$0 sm:$0xff] }
  0x12   :  { %v347_v23 = vld [vmem:[#allocation5 + $0x8] sm:$0xff]  ;;  %v346_v24 = vld [vmem:[#allocation5] sm:$0xff] }
  0x13   :  { %v360_v25 = vld [vmem:[%s513_s4] ss:$0 sm:$0xff] }
  0x14   :  { %241 = vmatpush.bf16.msra.mxu2 %v352_v12  ;;  %v361_v31 = vld [vmem:[%s515_s6] ss:$0 sm:$0xff] }
  0x15   :  { %159 = vmatpush.bf16.msra.mxu1 %v343_v5 }
  0x18   :  { %242 = vmatpush.bf16.msra.mxu2 %v351_v13 }
  0x19   :  { %160 = vmatpush.bf16.msra.mxu1 %v342_v6 }
  0x1c   :  { %243 = vmatpush.bf16.msra.mxu2 %v350_v14 }
  0x1d   :  { %161 = vmatpush.bf16.msra.mxu1 %v341_v7 }
  0x20   :  { %244 = vmatpush.bf16.msra.mxu2 %v349_v15 }
  0x21   :  { %162 = vmatpush.bf16.msra.mxu1 %v340_v8 }
  0x24   :  { %245 = vmatpush.bf16.msra.mxu2 %v348_v16 }
  0x25   :  { %163 = vmatpush.bf16.msra.mxu1 %v339_v9 }
  0x28   :  { %246 = vmatpush.bf16.msra.mxu2 %v347_v23 }
  0x29   :  { %164 = vmatpush.bf16.msra.mxu1 %v338_v10 }
  0x2c   :  { %247 = vmatpush.bf16.msra.mxu2 %v346_v24 }
  0x8e   :  { %v83_v18 = vpop.f32.mrf.mxu0 }
  0x8f   :  { %v84_v19 = vadd.f32 %v359_v17, %v83_v18 }
  0x91   :  { %v87_v20 = vmax.f32 %v84_v19, 0.0 }
  0x93   :  { %v88_v21 = vpack.c.bf16 %v87_v20, %v87_v20 }
  0x95   :  { %165 = vmatmul.bf16.vlgmr.msra.gmra.mxu1 %v88_v21 }
  0x96   :  { %v85_v22 = vpop.f32.mrf.mxu0 }
 0x112   :  { %v166_v26 = vpop.f32.mrf.mxu1 }
 0x113   :  { %v167_v27 = vadd.f32 %v360_v25, %v166_v26 }
 0x115   :  { %v170_v28 = vmax.f32 %v167_v27, 0.0 }
 0x117   :  { %v171_v29 = vpack.c.bf16 %v170_v28, %v170_v28 }
 0x119   :  { %248 = vmatmul.bf16.vlgmr.msra.gmra.mxu2 %v171_v29 }
 0x11a   :  { %v168_v30 = vpop.f32.mrf.mxu1 }
 0x19c   :  { %v249_v32 = vpop.f32.mrf.mxu2 }
 0x19d   :  { %v250_v33 = vadd.f32 %v361_v31, %v249_v32 }
 0x19f   :  { %v253_v34 = vpack.c.bf16 %v250_v33, %v250_v33 }
 0x1a1   :  { %254 = vst [vmem:[#allocation7] sm:$0xf] %v253_v34 }
 0x1a2   :  { %265 = dma.vmem_to_hbm [thread:$0]  %s261_s19, 64, %s263_s22, [#allocation4]  }
 0x1a4   :  { %v251_v35 = vpop.f32.mrf.mxu2 }
 0x1a5   :  { %438 = dma.done.wait [#allocation4], 64  }
 0x1a6   :  { %439 = vsyncadd [#allocation4], 4294967232 }
 0x1a7   :  { %270 = vsyncpa [#allocation3], 1 }
 0x1a8   :  { %271 = vsyncpa [#allocation6], 1 }
 0x1a9   :  { %272 = vsyncpa [#allocation4], 1 }

</bundles_post_ra>
